<compile_context>
chip_gen: v7x
topology: tpu7x:2x2x1
jax: 0.10.0
libtpu: 0.0.40
codegen_flags: <defaults>
</compile_context>

<pallas_src>
import functools

import jax
import jax.numpy as jnp
import numpy as np
from jax.experimental import pallas as pl
from jax.experimental.pallas import tpu as pltpu


# ----------------------------------------------------------------------------
# Fused Pallas kernel (one sample per grid step, everything stays in VMEM)
# ----------------------------------------------------------------------------

def _fused_inverted_residual_kernel(x_ref, *refs, H, W, hidden, has_expand, use_res):
    if has_expand:
        (w1e_ref, b1e_ref,
         dwmix_ref, dfc1_ref, dfb1_ref, dfc2_ref, dfb2_ref,
         w2_ref, b2_ref, o_ref) = refs
    else:
        (dwmix_ref, dfc1_ref, dfb1_ref, dfc2_ref, dfb2_ref,
         w2_ref, b2_ref, o_ref) = refs

    HW = H * W
    x2 = x_ref[0]                                            # (Cin, H*W), lane-dense

    # ---- expand stage: folded (branch-mix + BN) 1x1 conv -> ReLU6; single MXU matmul
    if has_expand:
        act = jnp.dot(w1e_ref[0], x2, preferred_element_type=jnp.float32) + b1e_ref[0]
        act = jnp.clip(act, 0.0, 6.0)                        # (hidden, HW)
    else:
        act = x2                                             # hidden == Cin

    # ---- depthwise AssConv gate: GAP -> 2-layer MLP -> softmax over 4 branches
    gap = jnp.mean(act, axis=1, keepdims=True)               # (hidden, 1)
    z = jnp.dot(dfc1_ref[...], gap, preferred_element_type=jnp.float32) + dfb1_ref[...]
    z = jnp.maximum(z, 0.0)
    g = jnp.dot(dfc2_ref[...], z, preferred_element_type=jnp.float32) + dfb2_ref[...]
    g = g - jnp.max(g, axis=0, keepdims=True)
    e = jnp.exp(g)
    wts = e / jnp.sum(e, axis=0, keepdims=True)              # (4, 1)

    # Fold the 4 depthwise branches (+BN) into ONE effective 3x3 kernel + bias.
    mixed = jnp.dot(dwmix_ref[...], wts, preferred_element_type=jnp.float32)  # (10*hidden, 1)
    b_dw = mixed[9 * hidden:, :]                                              # (hidden, 1)

    # 9-tap depthwise conv on the flattened (C, H*W) layout.
    #   * H-boundary handled by zero extension along the flat axis (concat with zeros);
    #   * W-boundary (wrap into the neighbouring row) handled by pre-zeroing the
    #     wrap-around source columns, shared across the 3 kh offsets.
    w_idx = jax.lax.broadcasted_iota(jnp.int32, (1, HW), 1) % W
    src_l = jnp.where(w_idx == W - 1, 0.0, act)              # sources for kw = 0 taps
    src_r = jnp.where(w_idx == 0, 0.0, act)                  # sources for kw = 2 taps
    zpad = jnp.zeros((hidden, W + 1), jnp.float32)
    padded = tuple(jnp.concatenate([zpad, s, zpad], axis=1)
                   for s in (src_l, act, src_r))             # each (hidden, HW + 2W + 2)

    acc = jnp.zeros((hidden, HW), jnp.float32)
    for kh in range(3):
        for kw in range(3):
            t = kh * 3 + kw
            start = (W + 1) + (kh - 1) * W + (kw - 1)
            tap = padded[kw][:, start:start + HW]
            acc = acc + tap * mixed[t * hidden:(t + 1) * hidden, :]
    act = jnp.clip(acc + b_dw, 0.0, 6.0)                     # ReLU6, (hidden, HW)

    # ---- project 1x1 + folded BN (+ residual)
    y = jnp.dot(w2_ref[...], act, preferred_element_type=jnp.float32) + b2_ref[...]
    if use_res:
        y = y + x2
    o_ref[0] = y.astype(o_ref.dtype)                         # (Cout, HW), lane-dense store


# ----------------------------------------------------------------------------
# Wrapper-side (sample-independent) parameter preparation
# ----------------------------------------------------------------------------

def _prep_kernel_params(params):
    pp = {}

    pd = params["depthwise"]
    s, b = pd["bn_scale"], pd["bn_bias"]                     # (5, hidden)
    hidden = pd["w_ori"].shape[-1]
    # Per-branch, BN-scaled per-tap weights, tap-major (t = kh*3 + kw).
    cols = [(s[i][None, None, :] * w).reshape(9, hidden)
            for i, w in enumerate((pd["w_ori"], pd["w_new"], pd["w_grp"]))]
    ac = jnp.zeros((3, 3, hidden), jnp.float32)
    ac = ac.at[:, 1, :].add(s[3][None, :] * pd["w_ver"])     # (3,1) vertical taps -> kw=1
    ac = ac.at[1, :, :].add(s[4][None, :] * pd["w_hor"])     # (1,3) horizontal taps -> kh=1
    cols.append(ac.reshape(9, hidden))
    w_taps = jnp.stack(cols, axis=-1).reshape(9 * hidden, 4)           # (9*hidden, 4)
    b_taps = jnp.stack([b[0], b[1], b[2], b[3] + b[4]], axis=1)        # (hidden, 4)
    pp["depthwise"] = dict(
        dw_mix=jnp.concatenate([w_taps, b_taps], axis=0),              # (10*hidden, 4)
        fc1_wt=pd["fc1_w"].T, fc1_b=pd["fc1_b"][:, None],
        fc2_wt=pd["fc2_w"].T, fc2_b=pd["fc2_b"][:, None])

    pj = params["project"]
    pp["project"] = dict(w2s=pj["bn_scale"][:, None] * pj["w"],        # (oup, hidden)
                         b2=pj["bn_bias"][:, None])                    # (oup, 1)
    return pp


def _expand_effective_weights(x_nchw, pe):
    """Exact per-sample fold of the expand-stage branch gates + BN into one 1x1 weight."""
    gap = jnp.mean(x_nchw, axis=(2, 3))                                # (N, Cin)
    h = jax.nn.relu(gap @ pe["fc1_w"] + pe["fc1_b"])
    wts = jax.nn.softmax(h @ pe["fc2_w"] + pe["fc2_b"], axis=1)        # (N, 3)
    w_stack = jnp.stack([pe["w_ori"], pe["w_new"], pe["w_grp_dense"]], axis=0)  # (3, hid, Cin)
    w_stack = pe["bn_scale"][:, :, None] * w_stack
    w_eff = jnp.einsum("nl,lhc->nhc", wts, w_stack)                    # (N, hidden, Cin)
    b_eff = (wts @ pe["bn_bias"])[:, :, None]                          # (N, hidden, 1)
    return w_eff, b_eff


# ----------------------------------------------------------------------------
# Forward wrapper around pallas_call
# ----------------------------------------------------------------------------

def inverted_residual_forward(x_nchw, params, *, stride, expand_ratio, use_res_connect):
    assert stride == 1, "only stride=1 implemented"  # TODO(synk): stride=2 variant
    N, cin, H, W = x_nchw.shape
    HW = H * W
    has_expand = expand_ratio != 1
    pp = _prep_kernel_params(params)
    cout, hidden = pp["project"]["w2s"].shape

    x2 = x_nchw.reshape(N, cin, HW)          # free reshape: channels->sublanes, H*W->lanes

    args = [x2]
    in_specs = [pl.BlockSpec((1, cin, HW), lambda n: (n, 0, 0))]

    def add_const(a):
        args.append(a)
        in_specs.append(pl.BlockSpec(a.shape, lambda n, nd=a.ndim: (0,) * nd))

    if has_expand:
        w1eff, b1eff = _expand_effective_weights(x_nchw, params["expand"])
        args += [w1eff, b1eff]
        in_specs += [pl.BlockSpec((1, hidden, cin), lambda n: (n, 0, 0)),
                     pl.BlockSpec((1, hidden, 1), lambda n: (n, 0, 0))]

    d = pp["depthwise"]
    for name in ("dw_mix", "fc1_wt", "fc1_b", "fc2_wt", "fc2_b"):
        add_const(d[name])
    add_const(pp["project"]["w2s"])
    add_const(pp["project"]["b2"])

    kernel = functools.partial(_fused_inverted_residual_kernel,
                               H=H, W=W, hidden=hidden,
                               has_expand=has_expand, use_res=use_res_connect)
    out = pl.pallas_call(
        kernel,
        out_shape=jax.ShapeDtypeStruct((N, cout, HW), jnp.float32),
        grid=(N,),
        in_specs=in_specs,
        out_specs=pl.BlockSpec((1, cout, HW), lambda n: (n, 0, 0)),
        compiler_params=pltpu.CompilerParams(dimension_semantics=("parallel",)),
    )(*args)
    return out.reshape(N, cout, H, W)


# ----------------------------------------------------------------------------
# Deterministic synthetic parameters (BN folded to scale/bias, inference mode)
# ----------------------------------------------------------------------------

def _fold_bn(gamma, beta, mean, var, eps=1e-5):
    scale = gamma / jnp.sqrt(var + eps)
    return scale, beta - mean * scale


def _make_bn(key, c):
    k = jax.random.split(key, 4)
    gamma = 1.0 + 0.1 * jax.random.normal(k[0], (c,), jnp.float32)
    beta = 0.1 * jax.random.normal(k[1], (c,), jnp.float32)
    mean = 0.1 * jax.random.normal(k[2], (c,), jnp.float32)
    var = jax.random.uniform(k[3], (c,), jnp.float32, 0.5, 1.5)
    return _fold_bn(gamma, beta, mean, var)


def _grouped1x1_to_dense(w_oi, groups, cin, cout):
    """PyTorch grouped 1x1 weight (cout, cin//groups) -> equivalent dense (cout, cin)."""
    cig, cog = cin // groups, cout // groups
    dense = jnp.zeros((cout, cin), jnp.float32)
    for g in range(groups):
        dense = dense.at[g * cog:(g + 1) * cog, g * cig:(g + 1) * cig].set(
            w_oi[g * cog:(g + 1) * cog, :])
    return dense


def init_params(key, inp, oup, expand_ratio):
    hidden = int(round(inp * expand_ratio))
    keys = iter(jax.random.split(key, 40))
    params = {}

    if expand_ratio != 1:
        # AssConv(inp, hidden, k=1, pad=0, groups=1): L = 3 branches (ori/new/group8).
        w_ori = 0.1 * jax.random.normal(next(keys), (hidden, inp), jnp.float32)
        w_new = 0.1 * jax.random.normal(next(keys), (hidden, inp), jnp.float32)
        g = 8 if inp >= 8 else 1
        w_grp = 0.1 * jax.random.normal(next(keys), (hidden, inp // g), jnp.float32)
        scales, biases = [], []
        for _ in range(3):
            s, b = _make_bn(next(keys), hidden)
            scales.append(s); biases.append(b)
        hf, L = max(inp // 4, 3), 3
        params["expand"] = dict(
            w_ori=w_ori, w_new=w_new,
            w_grp_dense=_grouped1x1_to_dense(w_grp, g, inp, hidden),
            bn_scale=jnp.stack(scales), bn_bias=jnp.stack(biases),
            fc1_w=0.2 * jax.random.normal(next(keys), (inp, hf), jnp.float32),
            fc1_b=0.1 * jax.random.normal(next(keys), (hf,), jnp.float32),
            fc2_w=0.2 * jax.random.normal(next(keys), (hf, L), jnp.float32),
            fc2_b=0.1 * jax.random.normal(next(keys), (L,), jnp.float32),
        )

    # AssConv(hidden, hidden, k=3, pad=1, groups=hidden): L = 4 branches (ori/new/grp/AC).
    w_ori = 0.2 * jax.random.normal(next(keys), (3, 3, hidden), jnp.float32)
    w_new = 0.2 * jax.random.normal(next(keys), (3, 3, hidden), jnp.float32)
    w_grp = 0.2 * jax.random.normal(next(keys), (3, 3, hidden), jnp.float32)
    w_ver = 0.2 * jax.random.normal(next(keys), (3, hidden), jnp.float32)
    w_hor = 0.2 * jax.random.normal(next(keys), (3, hidden), jnp.float32)
    scales, biases = [], []
    for _ in range(5):                                   # ori, new, group, ver, hor
        s, b = _make_bn(next(keys), hidden)
        scales.append(s); biases.append(b)
    hf, L = max(hidden // 4, 3), 4
    params["depthwise"] = dict(
        w_ori=w_ori, w_new=w_new, w_grp=w_grp, w_ver=w_ver, w_hor=w_hor,
        bn_scale=jnp.stack(scales), bn_bias=jnp.stack(biases),
        fc1_w=0.2 * jax.random.normal(next(keys), (hidden, hf), jnp.float32),
        fc1_b=0.1 * jax.random.normal(next(keys), (hf,), jnp.float32),
        fc2_w=0.2 * jax.random.normal(next(keys), (hf, L), jnp.float32),
        fc2_b=0.1 * jax.random.normal(next(keys), (L,), jnp.float32),
    )

    # Final 1x1 Conv2d(hidden, oup, bias=False) + BN(oup).
    w = 0.1 * jax.random.normal(next(keys), (oup, hidden), jnp.float32)
    s, b = _make_bn(next(keys), oup)
    params["project"] = dict(w=w, bn_scale=s, bn_bias=b)
    return params


# ----------------------------------------------------------------------------
# Pure-JAX reference (unfused, per-branch, same math) for validation
# ----------------------------------------------------------------------------

def reference_forward(x_nchw, params, *, stride, expand_ratio, use_res_connect):
    assert stride == 1
    x = jnp.transpose(x_nchw, (0, 2, 3, 1))                  # NHWC
    h = x
    if expand_ratio != 1:
        p = params["expand"]
        gap = jnp.mean(h, axis=(1, 2))
        wts = jax.nn.softmax(
            jax.nn.relu(gap @ p["fc1_w"] + p["fc1_b"]) @ p["fc2_w"] + p["fc2_b"], axis=1)
        def b1x1(w, i):
            return jnp.einsum("nhwc,dc->nhwd", h, w) * p["bn_scale"][i] + p["bn_bias"][i]
        y = (b1x1(p["w_ori"], 0) * wts[:, 0, None, None, None]
             + b1x1(p["w_new"], 1) * wts[:, 1, None, None, None]
             + b1x1(p["w_grp_dense"], 2) * wts[:, 2, None, None, None])
        h = jnp.clip(y, 0.0, 6.0)

    p = params["depthwise"]
    gap = jnp.mean(h, axis=(1, 2))
    wts = jax.nn.softmax(
        jax.nn.relu(gap @ p["fc1_w"] + p["fc1_b"]) @ p["fc2_w"] + p["fc2_b"], axis=1)
    N, H, W, C = h.shape
    xp = jnp.pad(h, ((0, 0), (1, 1), (1, 1), (0, 0)))
    def dw3x3(w):
        acc = jnp.zeros((N, H, W, C), jnp.float32)
        for kh in range(3):
            for kw in range(3):
                acc = acc + xp[:, kh:kh + H, kw:kw + W, :] * w[kh, kw]
        return acc
    def dwv(w):
        acc = jnp.zeros((N, H, W, C), jnp.float32)
        for kh in range(3):
            acc = acc + xp[:, kh:kh + H, 1:1 + W, :] * w[kh]
        return acc
    def dwh(w):
        acc = jnp.zeros((N, H, W, C), jnp.float32)
        for kw in range(3):
            acc = acc + xp[:, 1:1 + H, kw:kw + W, :] * w[kw]
        return acc
    s, b = p["bn_scale"], p["bn_bias"]
    y = ((dw3x3(p["w_ori"]) * s[0] + b[0]) * wts[:, 0, None, None, None]
         + (dw3x3(p["w_new"]) * s[1] + b[1]) * wts[:, 1, None, None, None]
         + (dw3x3(p["w_grp"]) * s[2] + b[2]) * wts[:, 2, None, None, None]
         + ((dwv(p["w_ver"]) * s[3] + b[3])
            + (dwh(p["w_hor"]) * s[4] + b[4])) * wts[:, 3, None, None, None])
    h = jnp.clip(y, 0.0, 6.0)

    p = params["project"]
    y = jnp.einsum("nhwc,dc->nhwd", h, p["w"]) * p["bn_scale"] + p["bn_bias"]
    if use_res_connect:
        y = y + x
    return jnp.transpose(y, (0, 3, 1, 2))


# ----------------------------------------------------------------------------
# Main
# ----------------------------------------------------------------------------

if __name__ == "__main__":
    key = jax.random.PRNGKey(0)
    kx, kp = jax.random.split(key)

    # InvertedResidual(inp=8, oup=8, stride=1, expand_ratio=2) -> hidden_dim=16,
    # use_res_connect=True.  Input (PyTorch NCHW): (2, 8, 16, 16).
    N, inp, H, W = 2, 8, 16, 16
    oup, stride, expand_ratio = 8, 1, 2
    use_res_connect = (stride == 1 and inp == oup)

    x = jax.random.normal(kx, (N, inp, H, W), jnp.float32)
    params = init_params(kp, inp, oup, expand_ratio)

    out = inverted_residual_forward(x, params, stride=stride,
                                    expand_ratio=expand_ratio,
                                    use_res_connect=use_res_connect)
    out = jax.block_until_ready(out)
    assert out.shape == (N, oup, H, W)

    ref = reference_forward(x, params, stride=stride, expand_ratio=expand_ratio,
                            use_res_connect=use_res_connect)
    np.testing.assert_allclose(np.asarray(out), np.asarray(ref), rtol=2e-3, atol=2e-3)

    print("KERNEL_OK")
</pallas_src>

<mosaic_0001>
module attributes {stable_mosaic.version = 11 : i64} {
  func.func @_fused_inverted_residual_kernel(%arg0: i32, %arg1: memref<1x8x256xf32, #tpu.memory_space<vmem>>, %arg2: memref<1x16x8xf32, #tpu.memory_space<vmem>>, %arg3: memref<1x16x1xf32, #tpu.memory_space<vmem>>, %arg4: memref<160x4xf32, #tpu.memory_space<vmem>>, %arg5: memref<4x16xf32, #tpu.memory_space<vmem>>, %arg6: memref<4x1xf32, #tpu.memory_space<vmem>>, %arg7: memref<4x4xf32, #tpu.memory_space<vmem>>, %arg8: memref<4x1xf32, #tpu.memory_space<vmem>>, %arg9: memref<8x16xf32, #tpu.memory_space<vmem>>, %arg10: memref<8x1xf32, #tpu.memory_space<vmem>>, %arg11: memref<1x8x256xf32, #tpu.memory_space<vmem>>) attributes {dimension_semantics = [#tpu.dimension_semantics<parallel>], iteration_bounds = array<i64: 2>, scalar_prefetch = 0 : i64, scratch_operands = 0 : i64, tpu.core_type = #tpu.core_type<tc>, window_params = [{transform_indices = @transform_0, window_bounds = array<i64: 1, 8, 256>}, {transform_indices = @transform_1, window_bounds = array<i64: 1, 16, 8>}, {transform_indices = @transform_2, window_bounds = array<i64: 1, 16, 1>}, {pipeline_mode = #tpu.pipeline_mode<synchronous>, transform_indices = @transform_3, window_bounds = array<i64: 160, 4>}, {pipeline_mode = #tpu.pipeline_mode<synchronous>, transform_indices = @transform_4, window_bounds = array<i64: 4, 16>}, {pipeline_mode = #tpu.pipeline_mode<synchronous>, transform_indices = @transform_5, window_bounds = array<i64: 4, 1>}, {pipeline_mode = #tpu.pipeline_mode<synchronous>, transform_indices = @transform_6, window_bounds = array<i64: 4, 4>}, {pipeline_mode = #tpu.pipeline_mode<synchronous>, transform_indices = @transform_7, window_bounds = array<i64: 4, 1>}, {pipeline_mode = #tpu.pipeline_mode<synchronous>, transform_indices = @transform_8, window_bounds = array<i64: 8, 16>}, {pipeline_mode = #tpu.pipeline_mode<synchronous>, transform_indices = @transform_9, window_bounds = array<i64: 8, 1>}, {transform_indices = @transform_10, window_bounds = array<i64: 1, 8, 256>}]} {
    %c0 = arith.constant 0 : index
    %c0_0 = arith.constant 0 : index
    %c0_1 = arith.constant 0 : index
    %0 = vector.load %arg1[%c0, %c0_0, %c0_1] : memref<1x8x256xf32, #tpu.memory_space<vmem>>, vector<1x8x256xf32>
    %1 = vector.shape_cast %0 : vector<1x8x256xf32> to vector<8x256xf32>
    %c0_2 = arith.constant 0 : index
    %c0_3 = arith.constant 0 : index
    %c0_4 = arith.constant 0 : index
    %2 = vector.load %arg2[%c0_2, %c0_3, %c0_4] : memref<1x16x8xf32, #tpu.memory_space<vmem>>, vector<1x16x8xf32>
    %3 = vector.shape_cast %2 : vector<1x16x8xf32> to vector<16x8xf32>
    %cst = arith.constant dense<0.000000e+00> : vector<16x256xf32>
    %4 = tpu.matmul %3, %1, %cst {dimension_numbers = #tpu.dot_dimension_numbers<[1], [0], [0], [1], [0, 0, 1, 1], [], []>} : vector<16x8xf32>, vector<8x256xf32>, vector<16x256xf32> -> vector<16x256xf32>
    %c0_5 = arith.constant 0 : index
    %c0_6 = arith.constant 0 : index
    %c0_7 = arith.constant 0 : index
    %5 = vector.load %arg3[%c0_5, %c0_6, %c0_7] : memref<1x16x1xf32, #tpu.memory_space<vmem>>, vector<1x16x1xf32>
    %6 = vector.shape_cast %5 : vector<1x16x1xf32> to vector<16x1xf32>
    %7 = vector.broadcast %6 : vector<16x1xf32> to vector<16x256xf32>
    %8 = arith.addf %4, %7 : vector<16x256xf32>
    %cst_8 = arith.constant 0.000000e+00 : f32
    %cst_9 = arith.constant 6.000000e+00 : f32
    %9 = vector.broadcast %cst_8 : f32 to vector<16x256xf32>
    %10 = arith.maximumf %9, %8 : vector<16x256xf32>
    %11 = vector.broadcast %cst_9 : f32 to vector<16x256xf32>
    %12 = arith.minimumf %11, %10 : vector<16x256xf32>
    %cst_10 = arith.constant dense<0.000000e+00> : vector<16xf32>
    %13 = vector.multi_reduction <add>, %12, %cst_10 [1] : vector<16x256xf32> to vector<16xf32>
    %14 = vector.shape_cast %13 : vector<16xf32> to vector<16x1xf32>
    %cst_11 = arith.constant 2.560000e+02 : f32
    %15 = vector.broadcast %cst_11 : f32 to vector<16x1xf32>
    %16 = arith.divf %14, %15 : vector<16x1xf32>
    %c0_12 = arith.constant 0 : index
    %c0_13 = arith.constant 0 : index
    %17 = vector.load %arg5[%c0_12, %c0_13] : memref<4x16xf32, #tpu.memory_space<vmem>>, vector<4x16xf32>
    %cst_14 = arith.constant dense<0.000000e+00> : vector<4x1xf32>
    %18 = tpu.matmul %17, %16, %cst_14 {dimension_numbers = #tpu.dot_dimension_numbers<[1], [0], [0], [1], [0, 0, 1, 1], [], []>} : vector<4x16xf32>, vector<16x1xf32>, vector<4x1xf32> -> vector<4x1xf32>
    %c0_15 = arith.constant 0 : index
    %c0_16 = arith.constant 0 : index
    %19 = vector.load %arg6[%c0_15, %c0_16] : memref<4x1xf32, #tpu.memory_space<vmem>>, vector<4x1xf32>
    %20 = arith.addf %18, %19 : vector<4x1xf32>
    %cst_17 = arith.constant 0.000000e+00 : f32
    %21 = vector.broadcast %cst_17 : f32 to vector<4x1xf32>
    %22 = arith.maximumf %20, %21 : vector<4x1xf32>
    %c0_18 = arith.constant 0 : index
    %c0_19 = arith.constant 0 : index
    %23 = vector.load %arg7[%c0_18, %c0_19] : memref<4x4xf32, #tpu.memory_space<vmem>>, vector<4x4xf32>
    %cst_20 = arith.constant dense<0.000000e+00> : vector<4x1xf32>
    %24 = tpu.matmul %23, %22, %cst_20 {dimension_numbers = #tpu.dot_dimension_numbers<[1], [0], [0], [1], [0, 0, 1, 1], [], []>} : vector<4x4xf32>, vector<4x1xf32>, vector<4x1xf32> -> vector<4x1xf32>
    %c0_21 = arith.constant 0 : index
    %c0_22 = arith.constant 0 : index
    %25 = vector.load %arg8[%c0_21, %c0_22] : memref<4x1xf32, #tpu.memory_space<vmem>>, vector<4x1xf32>
    %26 = arith.addf %24, %25 : vector<4x1xf32>
    %cst_23 = arith.constant dense<0xFF800000> : vector<1xf32>
    %27 = vector.multi_reduction <maximumf>, %26, %cst_23 [0] : vector<4x1xf32> to vector<1xf32>
    %28 = vector.shape_cast %27 : vector<1xf32> to vector<1x1xf32>
    %29 = vector.broadcast %28 : vector<1x1xf32> to vector<4x1xf32>
    %30 = arith.subf %26, %29 : vector<4x1xf32>
    %31 = math.exp %30 : vector<4x1xf32>
    %cst_24 = arith.constant dense<0.000000e+00> : vector<1xf32>
    %32 = vector.multi_reduction <add>, %31, %cst_24 [0] : vector<4x1xf32> to vector<1xf32>
    %33 = vector.shape_cast %32 : vector<1xf32> to vector<1x1xf32>
    %34 = vector.broadcast %33 : vector<1x1xf32> to vector<4x1xf32>
    %35 = arith.divf %31, %34 : vector<4x1xf32>
    %c0_25 = arith.constant 0 : index
    %c0_26 = arith.constant 0 : index
    %36 = vector.load %arg4[%c0_25, %c0_26] : memref<160x4xf32, #tpu.memory_space<vmem>>, vector<160x4xf32>
    %cst_27 = arith.constant dense<0.000000e+00> : vector<160x1xf32>
    %37 = tpu.matmul %36, %35, %cst_27 {dimension_numbers = #tpu.dot_dimension_numbers<[1], [0], [0], [1], [0, 0, 1, 1], [], []>} : vector<160x4xf32>, vector<4x1xf32>, vector<160x1xf32> -> vector<160x1xf32>
    %38 = vector.extract_strided_slice %37 {offsets = [144, 0], sizes = [16, 1], strides = [1, 1]} : vector<160x1xf32> to vector<16x1xf32>
    %39 = tpu.iota {dimensions = array<i32: 1>} : vector<1x256xi32>
    %c16_i32 = arith.constant 16 : i32
    %c0_i32 = arith.constant 0 : i32
    %40 = arith.cmpi eq, %c16_i32, %c0_i32 : i32
    %c1_i32 = arith.constant 1 : i32
    %41 = arith.select %40, %c1_i32, %c16_i32 : i32
    %42 = vector.broadcast %41 : i32 to vector<1x256xi32>
    %43 = arith.remsi %39, %42 : vector<1x256xi32>
    %c0_i32_28 = arith.constant 0 : i32
    %44 = vector.broadcast %c0_i32_28 : i32 to vector<1x256xi32>
    %45 = arith.cmpi ne, %43, %44 : vector<1x256xi32>
    %c0_i32_29 = arith.constant 0 : i32
    %46 = vector.broadcast %c0_i32_29 : i32 to vector<1x256xi32>
    %47 = arith.cmpi slt, %43, %46 : vector<1x256xi32>
    %c0_i32_30 = arith.constant 0 : i32
    %48 = arith.cmpi slt, %41, %c0_i32_30 : i32
    %49 = vector.broadcast %48 : i1 to vector<1x256xi1>
    %50 = vector.broadcast %49 : vector<1x256xi1> to vector<1x256xi1>
    %51 = arith.xori %47, %50 : vector<1x256xi1>
    %52 = arith.andi %51, %45 : vector<1x256xi1>
    %53 = vector.broadcast %41 : i32 to vector<1x256xi32>
    %54 = arith.addi %43, %53 : vector<1x256xi32>
    %55 = arith.select %52, %54, %43 : vector<1x256xi1>, vector<1x256xi32>
    %c15_i32 = arith.constant 15 : i32
    %56 = vector.broadcast %c15_i32 : i32 to vector<1x256xi32>
    %57 = arith.cmpi eq, %55, %56 : vector<1x256xi32>
    %cst_31 = arith.constant 0.000000e+00 : f32
    %58 = vector.shape_cast %57 : vector<1x256xi1> to vector<1x256xi1>
    %59 = vector.broadcast %58 : vector<1x256xi1> to vector<16x256xi1>
    %60 = vector.broadcast %cst_31 : f32 to vector<16x256xf32>
    %61 = arith.select %59, %60, %12 : vector<16x256xi1>, vector<16x256xf32>
    %c0_i32_32 = arith.constant 0 : i32
    %62 = vector.broadcast %c0_i32_32 : i32 to vector<1x256xi32>
    %63 = arith.cmpi eq, %55, %62 : vector<1x256xi32>
    %cst_33 = arith.constant 0.000000e+00 : f32
    %64 = vector.shape_cast %63 : vector<1x256xi1> to vector<1x256xi1>
    %65 = vector.broadcast %64 : vector<1x256xi1> to vector<16x256xi1>
    %66 = vector.broadcast %cst_33 : f32 to vector<16x256xf32>
    %67 = arith.select %65, %66, %12 : vector<16x256xi1>, vector<16x256xf32>
    %cst_34 = arith.constant 0.000000e+00 : f32
    %68 = vector.broadcast %cst_34 : f32 to vector<16x17xf32>
    %69 = tpu.concatenate %68, %61, %68 in 1 : vector<16x17xf32>, vector<16x256xf32>, vector<16x17xf32> -> vector<16x290xf32>
    %70 = tpu.concatenate %68, %12, %68 in 1 : vector<16x17xf32>, vector<16x256xf32>, vector<16x17xf32> -> vector<16x290xf32>
    %71 = tpu.concatenate %68, %67, %68 in 1 : vector<16x17xf32>, vector<16x256xf32>, vector<16x17xf32> -> vector<16x290xf32>
    %cst_35 = arith.constant 0.000000e+00 : f32
    %72 = vector.broadcast %cst_35 : f32 to vector<16x256xf32>
    %73 = vector.extract_strided_slice %69 {offsets = [0, 0], sizes = [16, 256], strides = [1, 1]} : vector<16x290xf32> to vector<16x256xf32>
    %74 = vector.extract_strided_slice %37 {offsets = [0, 0], sizes = [16, 1], strides = [1, 1]} : vector<160x1xf32> to vector<16x1xf32>
    %75 = vector.broadcast %74 : vector<16x1xf32> to vector<16x256xf32>
    %76 = arith.mulf %73, %75 : vector<16x256xf32>
    %77 = arith.addf %72, %76 : vector<16x256xf32>
    %78 = vector.extract_strided_slice %70 {offsets = [0, 1], sizes = [16, 256], strides = [1, 1]} : vector<16x290xf32> to vector<16x256xf32>
    %79 = vector.extract_strided_slice %37 {offsets = [16, 0], sizes = [16, 1], strides = [1, 1]} : vector<160x1xf32> to vector<16x1xf32>
    %80 = vector.broadcast %79 : vector<16x1xf32> to vector<16x256xf32>
    %81 = arith.mulf %78, %80 : vector<16x256xf32>
    %82 = arith.addf %77, %81 : vector<16x256xf32>
    %83 = vector.extract_strided_slice %71 {offsets = [0, 2], sizes = [16, 256], strides = [1, 1]} : vector<16x290xf32> to vector<16x256xf32>
    %84 = vector.extract_strided_slice %37 {offsets = [32, 0], sizes = [16, 1], strides = [1, 1]} : vector<160x1xf32> to vector<16x1xf32>
    %85 = vector.broadcast %84 : vector<16x1xf32> to vector<16x256xf32>
    %86 = arith.mulf %83, %85 : vector<16x256xf32>
    %87 = arith.addf %82, %86 : vector<16x256xf32>
    %88 = vector.extract_strided_slice %69 {offsets = [0, 16], sizes = [16, 256], strides = [1, 1]} : vector<16x290xf32> to vector<16x256xf32>
    %89 = vector.extract_strided_slice %37 {offsets = [48, 0], sizes = [16, 1], strides = [1, 1]} : vector<160x1xf32> to vector<16x1xf32>
    %90 = vector.broadcast %89 : vector<16x1xf32> to vector<16x256xf32>
    %91 = arith.mulf %88, %90 : vector<16x256xf32>
    %92 = arith.addf %87, %91 : vector<16x256xf32>
    %93 = vector.extract_strided_slice %70 {offsets = [0, 17], sizes = [16, 256], strides = [1, 1]} : vector<16x290xf32> to vector<16x256xf32>
    %94 = vector.extract_strided_slice %37 {offsets = [64, 0], sizes = [16, 1], strides = [1, 1]} : vector<160x1xf32> to vector<16x1xf32>
    %95 = vector.broadcast %94 : vector<16x1xf32> to vector<16x256xf32>
    %96 = arith.mulf %93, %95 : vector<16x256xf32>
    %97 = arith.addf %92, %96 : vector<16x256xf32>
    %98 = vector.extract_strided_slice %71 {offsets = [0, 18], sizes = [16, 256], strides = [1, 1]} : vector<16x290xf32> to vector<16x256xf32>
    %99 = vector.extract_strided_slice %37 {offsets = [80, 0], sizes = [16, 1], strides = [1, 1]} : vector<160x1xf32> to vector<16x1xf32>
    %100 = vector.broadcast %99 : vector<16x1xf32> to vector<16x256xf32>
    %101 = arith.mulf %98, %100 : vector<16x256xf32>
    %102 = arith.addf %97, %101 : vector<16x256xf32>
    %103 = vector.extract_strided_slice %69 {offsets = [0, 32], sizes = [16, 256], strides = [1, 1]} : vector<16x290xf32> to vector<16x256xf32>
    %104 = vector.extract_strided_slice %37 {offsets = [96, 0], sizes = [16, 1], strides = [1, 1]} : vector<160x1xf32> to vector<16x1xf32>
    %105 = vector.broadcast %104 : vector<16x1xf32> to vector<16x256xf32>
    %106 = arith.mulf %103, %105 : vector<16x256xf32>
    %107 = arith.addf %102, %106 : vector<16x256xf32>
    %108 = vector.extract_strided_slice %70 {offsets = [0, 33], sizes = [16, 256], strides = [1, 1]} : vector<16x290xf32> to vector<16x256xf32>
    %109 = vector.extract_strided_slice %37 {offsets = [112, 0], sizes = [16, 1], strides = [1, 1]} : vector<160x1xf32> to vector<16x1xf32>
    %110 = vector.broadcast %109 : vector<16x1xf32> to vector<16x256xf32>
    %111 = arith.mulf %108, %110 : vector<16x256xf32>
    %112 = arith.addf %107, %111 : vector<16x256xf32>
    %113 = vector.extract_strided_slice %71 {offsets = [0, 34], sizes = [16, 256], strides = [1, 1]} : vector<16x290xf32> to vector<16x256xf32>
    %114 = vector.extract_strided_slice %37 {offsets = [128, 0], sizes = [16, 1], strides = [1, 1]} : vector<160x1xf32> to vector<16x1xf32>
    %115 = vector.broadcast %114 : vector<16x1xf32> to vector<16x256xf32>
    %116 = arith.mulf %113, %115 : vector<16x256xf32>
    %117 = arith.addf %112, %116 : vector<16x256xf32>
    %118 = vector.broadcast %38 : vector<16x1xf32> to vector<16x256xf32>
    %119 = arith.addf %117, %118 : vector<16x256xf32>
    %cst_36 = arith.constant 0.000000e+00 : f32
    %cst_37 = arith.constant 6.000000e+00 : f32
    %120 = vector.broadcast %cst_36 : f32 to vector<16x256xf32>
    %121 = arith.maximumf %120, %119 : vector<16x256xf32>
    %122 = vector.broadcast %cst_37 : f32 to vector<16x256xf32>
    %123 = arith.minimumf %122, %121 : vector<16x256xf32>
    %c0_38 = arith.constant 0 : index
    %c0_39 = arith.constant 0 : index
    %124 = vector.load %arg9[%c0_38, %c0_39] : memref<8x16xf32, #tpu.memory_space<vmem>>, vector<8x16xf32>
    %cst_40 = arith.constant dense<0.000000e+00> : vector<8x256xf32>
    %125 = tpu.matmul %124, %123, %cst_40 {dimension_numbers = #tpu.dot_dimension_numbers<[1], [0], [0], [1], [0, 0, 1, 1], [], []>} : vector<8x16xf32>, vector<16x256xf32>, vector<8x256xf32> -> vector<8x256xf32>
    %c0_41 = arith.constant 0 : index
    %c0_42 = arith.constant 0 : index
    %126 = vector.load %arg10[%c0_41, %c0_42] : memref<8x1xf32, #tpu.memory_space<vmem>>, vector<8x1xf32>
    %127 = vector.broadcast %126 : vector<8x1xf32> to vector<8x256xf32>
    %128 = arith.addf %125, %127 : vector<8x256xf32>
    %129 = arith.addf %128, %1 : vector<8x256xf32>
    %c0_43 = arith.constant 0 : index
    %c0_44 = arith.constant 0 : index
    %c0_45 = arith.constant 0 : index
    %130 = vector.load %arg11[%c0_43, %c0_44, %c0_45] : memref<1x8x256xf32, #tpu.memory_space<vmem>>, vector<1x8x256xf32>
    %131 = vector.shape_cast %130 : vector<1x8x256xf32> to vector<8x256xf32>
    %132 = vector.shape_cast %129 : vector<8x256xf32> to vector<1x8x256xf32>
    tpu.vector_store %arg11[%c0_43, %c0_44, %c0_45], %132 {strides = array<i32>} : memref<1x8x256xf32, #tpu.memory_space<vmem>>, vector<1x8x256xf32>,
    return
  }
  func.func @transform_0(%arg0: i32) -> (i32, i32, i32) {
    %c0_i32 = arith.constant 0 : i32
    %c0_i32_0 = arith.constant 0 : i32
    %c0_i32_1 = arith.constant 0 : i32
    return %arg0, %c0_i32, %c0_i32_0 : i32, i32, i32
  }
  func.func @transform_1(%arg0: i32) -> (i32, i32, i32) {
    %c0_i32 = arith.constant 0 : i32
    %c0_i32_0 = arith.constant 0 : i32
    %c0_i32_1 = arith.constant 0 : i32
    return %arg0, %c0_i32, %c0_i32_0 : i32, i32, i32
  }
  func.func @transform_2(%arg0: i32) -> (i32, i32, i32) {
    %c0_i32 = arith.constant 0 : i32
    %c0_i32_0 = arith.constant 0 : i32
    %c0_i32_1 = arith.constant 0 : i32
    return %arg0, %c0_i32, %c0_i32_0 : i32, i32, i32
  }
  func.func @transform_3(%arg0: i32) -> (i32, i32) {
    %c0_i32 = arith.constant 0 : i32
    %c0_i32_0 = arith.constant 0 : i32
    %c0_i32_1 = arith.constant 0 : i32
    return %c0_i32, %c0_i32_0 : i32, i32
  }
  func.func @transform_4(%arg0: i32) -> (i32, i32) {
    %c0_i32 = arith.constant 0 : i32
    %c0_i32_0 = arith.constant 0 : i32
    %c0_i32_1 = arith.constant 0 : i32
    return %c0_i32, %c0_i32_0 : i32, i32
  }
  func.func @transform_5(%arg0: i32) -> (i32, i32) {
    %c0_i32 = arith.constant 0 : i32
    %c0_i32_0 = arith.constant 0 : i32
    %c0_i32_1 = arith.constant 0 : i32
    return %c0_i32, %c0_i32_0 : i32, i32
  }
  func.func @transform_6(%arg0: i32) -> (i32, i32) {
    %c0_i32 = arith.constant 0 : i32
    %c0_i32_0 = arith.constant 0 : i32
    %c0_i32_1 = arith.constant 0 : i32
    return %c0_i32, %c0_i32_0 : i32, i32
  }
  func.func @transform_7(%arg0: i32) -> (i32, i32) {
    %c0_i32 = arith.constant 0 : i32
    %c0_i32_0 = arith.constant 0 : i32
    %c0_i32_1 = arith.constant 0 : i32
    return %c0_i32, %c0_i32_0 : i32, i32
  }
  func.func @transform_8(%arg0: i32) -> (i32, i32) {
    %c0_i32 = arith.constant 0 : i32
    %c0_i32_0 = arith.constant 0 : i32
    %c0_i32_1 = arith.constant 0 : i32
    return %c0_i32, %c0_i32_0 : i32, i32
  }
  func.func @transform_9(%arg0: i32) -> (i32, i32) {
    %c0_i32 = arith.constant 0 : i32
    %c0_i32_0 = arith.constant 0 : i32
    %c0_i32_1 = arith.constant 0 : i32
    return %c0_i32, %c0_i32_0 : i32, i32
  }
  func.func @transform_10(%arg0: i32) -> (i32, i32, i32) {
    %c0_i32 = arith.constant 0 : i32
    %c0_i32_0 = arith.constant 0 : i32
    %c0_i32_1 = arith.constant 0 : i32
    return %arg0, %c0_i32, %c0_i32_0 : i32, i32, i32
  }
}

</mosaic_0001>

<bundles_post_ra>
// kernel: tpu_custom_call.1
= control target key start
LH: loop header
LB: loop body
LE: loop exit
PB: predicated region body
PF: predicated region fallthrough
CT: control target
= control target key end

     0   :  { %15 = vsyncpa [#allocation3], 0  ;;  %s2423_s0 = inlined_call_operand.vmem [shape: f32[2,8,256], index: 0, kind: input, shape index: {}]   ;;  %s2424_s1 = inlined_call_operand.vmem [shape: f32[2,16,8], index: 1, kind: input, shape index: {}]   ;;  %s2425_s2 = inlined_call_operand.vmem [shape: f32[2,16,1], index: 2, kind: input, shape index: {}]   ;;  %s2426_s3 = inlined_call_operand.vmem [shape: f32[160,4], index: 3, kind: input, shape index: {}]   ;;  %s2427_s4 = inlined_call_operand.vmem [shape: f32[4,16], index: 4, kind: input, shape index: {}]   ;;  %s2428_s5 = inlined_call_operand.vmem [shape: f32[4,1], index: 5, kind: input, shape index: {}]   ;;  %s2429_s6 = inlined_call_operand.vmem [shape: f32[4,4], index: 6, kind: input, shape index: {}]   ;;  %s2430_s7 = inlined_call_operand.vmem [shape: f32[4,1], index: 7, kind: input, shape index: {}]   ;;  %s2431_s8 = inlined_call_operand.vmem [shape: f32[8,16], index: 8, kind: input, shape index: {}]   ;;  %s2432_s9 = inlined_call_operand.vmem [shape: f32[8,1], index: 9, kind: input, shape index: {}]   ;;  %s2433_s10 = inlined_call_operand.hbm [shape: f32[2,8,256], index: 10, kind: output, shape index: {}]  }
   0x1   :  { %17 = vsyncpa [#allocation3 + $0x1], 0  ;;  %s1977_s13 = smov 0   ;;  %s1979_s14 = smov 0  }
   0x2   :  { %s1981_s15 = smov 0   ;;  %s1983_s16 = smov 0  }
   0x3 LB: > { %s1998_s17 = sadd.s32 4294967295, %s1906_s16   ;;  %s1659_s18 = sadd.s32 4294967294, %s1906_s16   ;;  %s1906_s16 = sphi %s1983_s16, %s2439_s16   ;;  %s1902_s15 = sphi %s1981_s15, %s2438_s15   ;;  %s1898_s14 = sphi %s1979_s14, %s2437_s14   ;;  %s1894_s13 = sphi %s1977_s13, %s2436_s13  }
   0x4   : > { %s2002_s19 = sadd.s32 1, %s1906_s16   ;;  %s255_s20 = sadd.s32 1, %s1902_s15 }
   0x5   : > { %s252_s21 = ssub.s32 %s1906_s16, %s2002_s19  ;;  %p265_p0 = scmp.ne.s32.totalorder %s1902_s15, %s1898_s14 }
   0x6   : > { %p253_p1 = scmp.eq.s32.totalorder %s252_s21, 0  ;;  %p266_p2 = scmp.eq.s32.totalorder %s1998_s17, 1 }
   0x7   : > { %p271_p3 = scmp.ne.s32.totalorder %s1898_s14, %s1894_s13  ;;  %p272_p4 = scmp.eq.s32.totalorder %s1659_s18, 1 }
   0x8   : > { %s2013_s22 = scalar_select %p253_p1, %s1902_s15, %s255_s20  }
   0x9   : > { %p2015_p5 = por %p266_p2, %p265_p0  ;;  %p2019_p6 = por %p272_p4, %p271_p3 }
   0xa   : > { %p1662_p7 = scmp.ge.s32.totalorder %s1906_s16, 1  ;;  %p335_p8 = scmp.lt.s32.totalorder %s1906_s16, 3 }
   0xc   : > { %p336_p9 = pnand %p1662_p7, %p335_p8 }
   0xd   : > { %p383_p10 = scmp.lt.s32.totalorder (!%p336_p9), %s1998_s17, 1  ;;  %v1908_v0 = vmov (!%p336_p9), 0.0   ;;  %v1909_v1 = vmov (!%p336_p9), 0   ;;  %vm414_vm0 = vcmask (!%p336_p9), 64512   ;;  %v940_v8 = vlaneseq (!%p336_p9)  ;;  %v515_v47 = vld [vmem:[%s2427_s4] sm:$0xf] (!%p336_p9) }
   0xe   : > { %339 = sbr.rel (%p336_p9) target bundleno = 1683 (0x693), region = 60  ;;  %485 = vmatprep.mubr.f32.mxu0 (!%p336_p9), %v1908_v0  ;;  %1837 = vset.pattern.permute.xlu0 (!%p336_p9), %v1909_v1  ;;  %v1911_v36 = vmov (!%p336_p9), 0.0|0.0   ;;  %vm1912_vm3 = vmmov (!%p336_p9), 0   ;;  %vm517_vm6 = vcmask (!%p336_p9), 130048   ;;  %v516_v48 = vld [vmem:[%s2428_s5] sm:$0xf] (!%p336_p9) }
   0xf   : > { %1838 = vset.pattern.permute.xlu1 (!%p336_p9), %v1909_v1  ;;  %v941_v11 = vand.u32 (!%p336_p9), 127, %v940_v8  ;;  %1776 = vmatprep.subr.bf16.mxu1 (!%p336_p9), %v1911_v36  ;;  %vm598_vm7 = vcmask (!%p336_p9), 1043456   ;;  %v592_v53 = vld [vmem:[%s2429_s6] sm:$0xf] (!%p336_p9)  ;;  %vm594_vm8 = vcmask (!%p336_p9), 31744   ;;  %vm672_vm9 = vcmask (!%p336_p9), 3072  }
  0x10   : > { %1736 = vmatprep.mubr.msk.f32.mxu1 (!%p336_p9), %vm1912_vm3, %v1908_v0  ;;  %v704_v54 = vld [vmem:[%s2426_s3 + $0x60] sm:$0xff] (!%p336_p9)  ;;  %vm999_vm10 = vcmask (!%p336_p9), 138240   ;;  %s1916_s27 = smov (!%p336_p9), 126   ;;  %s1917_s28 = smov (!%p336_p9), 94   ;;  %vm1347_vm11 = vcmask (!%p336_p9), 785408   ;;  %vm1112_vm12 = vcmask (!%p336_p9), 1039360  }
  0x11   : > { %v942_v19 = vadd.s32 (!%p336_p9), 128, %v941_v11  ;;  %v947_v37 = vand.u32 (!%p336_p9), 15, %v941_v11  ;;  %v692_v55 = vld [vmem:[%s2426_s3] sm:$0xff] (!%p336_p9)  ;;  %s1918_s30 = smov (!%p336_p9), 112   ;;  %s1919_s11 = smov (!%p336_p9), 111   ;;  %vm1394_vm13 = vcmask (!%p336_p9), 777216  }
  0x12   : > { %v593_v56 = vld [vmem:[%s2430_s7] sm:$0xf] (!%p336_p9)  ;;  %vm1159_vm14 = vcmask (!%p336_p9), 1031168   ;;  %vm1206_vm15 = vcmask (!%p336_p9), 916480  }
  0x13   : > { %v954_v28 = vand.u32 (!%p336_p9), 15, %v942_v19  ;;  %vm977_vm4 = vcmp.eq.s32.totalorder (!%p336_p9), %v947_v37, 0  ;;  %vm967_vm5 = vcmp.eq.s32.totalorder (!%p336_p9), %v947_v37, 15  ;;  %v706_v19 = vld [vmem:[%s2426_s3 + $0x70] sm:$0xff] (!%p336_p9) }
  0x15   : > { %s384_s25 = scalar_select %p383_p10, %s1998_s17, 1  ;;  %vm978_vm1 = vcmp.eq.s32.totalorder %v954_v28, 0  ;;  %vm968_vm2 = vcmp.eq.s32.totalorder %v954_v28, 15  ;;  %v710_v28 = vld [vmem:[%s2426_s3 + $0x90] sm:$0xff] }
  0x17   : > { %s1702_s26 = sshll.u32 %s384_s25, 4  ;;  %s1910_s25 = smov 17  }
  0x18   : > { %s2031_s29 = scalar_lea.vmem %s2423_s0, %s1702_s26  ;;  %s392_s12 = scalar_lea.vmem %s2424_s1, %s1702_s26 }
  0x19   : > { %v399_v2 = vld [vmem:[%s2031_s29 + $0x8] sm:$0xff]  ;;  %v2038_v3 = vld [vmem:[%s2031_s29] sm:$0xff]  ;;  %s397_s21 = scalar_lea.vmem %s2425_s2, %s1702_s26  ;;  %s1915_s26 = smov 95  }
  0x1a   : > { %v400_v4 = vld [vmem:[%s392_s12] sm:$0xff]  ;;  %421 = vmatprep.subr.mxu0 %v399_v2  ;;  %v403_v6 = vld [vmem:[%s397_s21 + $0x8] sm:$0xff] }
  0x1b   : > { %v402_v5 = vld [vmem:[%s397_s21] sm:$0xff]  ;;  %422 = vmatpush1.msra.mxu0 %v2038_v3  ;;  %v401_v7 = vld [vmem:[%s392_s12 + $0x8] sm:$0xff]  ;;  %s1913_s21 = smov 96   ;;  %s1920_s12 = smov 110  }
  0x1c   : > { %406 = vperm.xlu0 %1837, %v402_v5   ;;  %1670 = vmatmul.mubr.msk.f32.vlgmr.msra.gmra.mrb[0].mxu0 %vm414_vm0, %v400_v4 }
  0x1d   : > { %491 = vmatprep.mubr.f32.mxu0 %v1908_v0 }
  0x20   : > { %411 = vperm.xlu0 %1837, %v403_v6   ;;  %1671 = vmatmul.mubr.msk.f32.gmra.mrb[2].mxu0 %vm414_vm0, %v401_v7  ;;  %vm1253_vm0 = vcmask 908288  }
  0x21   : > { %1746 = vmatprep.mubr.msk.f32.mxu0 %vm594_vm8, %v692_v55 }
  0x9b   : > { %v407_v9 = vpop.permute.xlu0 %406 }
  0x9f   : > { %v412_v16 = vpop.permute.xlu0 %411 }
  0xef   : > { %v487_v10 = vpop.f32.mrb[0].mxu0 }
  0xf0   : > { %v488_v12 = vadd.f32 %v487_v10, %v407_v9  ;;  %v489_v13 = vpop.f32.mrb[1].mxu0 }
  0xf1   : > { %v490_v14 = vadd.f32 %v489_v13, %v407_v9 }
  0xf2   : > { %v498_v15 = vmax.f32 %v488_v12, 0.0 }
  0xf3   : > { %v499_v17 = vmax.f32 %v490_v14, 0.0  ;;  %v493_v18 = vpop.f32.mrb[2].mxu0 }
  0xf4   : > { %v502_v20 = vmin.f32 %v498_v15, 6.0  ;;  %v494_v21 = vadd.f32 %v493_v18, %v412_v16  ;;  %v495_v22 = vpop.f32.mrb[3].mxu0  ;;  %v693_v18 = vld [vmem:[%s2426_s3 + $0x8] sm:$0xff] }
  0xf5   : > { %v503_v23 = vmin.f32 %v499_v17, 6.0  ;;  %v496_v24 = vadd.f32 %v495_v22, %v412_v16  ;;  %v705_v17 = vld [vmem:[%s2426_s3 + $0x68] sm:$0xff]  ;;  %v695_v22 = vld [vmem:[%s2426_s3 + $0x18] sm:$0xff] }
  0xf6   : > { %v500_v25 = vmax.f32 %v494_v21, 0.0  ;;  %v983_v38 = vsel %vm977_vm4, 0.0, %v502_v20  ;;  %v973_v40 = vsel %vm967_vm5, 0.0, %v502_v20  ;;  %v707_v21 = vld [vmem:[%s2426_s3 + $0x78] sm:$0xff] }
  0xf7   : > { %v501_v26 = vmax.f32 %v496_v24, 0.0  ;;  %1018 = vrot.lane.b32.xlu0 %v503_v23, %s1910_s25  ;;  %v506_v27 = vadd.f32 %v503_v23, %v502_v20  ;;  %v984_v32 = vsel %vm978_vm1, 0.0, %v503_v23  ;;  %v974_v34 = vsel %vm968_vm2, 0.0, %v503_v23  ;;  %v696_v23 = vld [vmem:[%s2426_s3 + $0x20] sm:$0xff] }
  0xf8   : > { %v504_v29 = vmin.f32 %v500_v25, 6.0  ;;  %v708_v24 = vld [vmem:[%s2426_s3 + $0x80] sm:$0xff]  ;;  %v697_v25 = vld [vmem:[%s2426_s3 + $0x28] sm:$0xff] }
  0xf9   : > { %v505_v30 = vmin.f32 %v501_v26, 6.0  ;;  %507 = vadd.xlane.f32.xlu1 %v506_v27  ;;  %v709_v26 = vld [vmem:[%s2426_s3 + $0x88] sm:$0xff]  ;;  %v698_v27 = vld [vmem:[%s2426_s3 + $0x30] sm:$0xff] }
  0xfa   : > { %v985_v39 = vsel %vm977_vm4, 0.0, %v504_v29  ;;  %v975_v41 = vsel %vm967_vm5, 0.0, %v504_v29 }
  0xfb   : > { %1022 = vrot.lane.b32.xlu0 %v505_v30, %s1910_s25  ;;  %v509_v31 = vadd.f32 %v505_v30, %v504_v29  ;;  %v986_v33 = vsel %vm978_vm1, 0.0, %v505_v30  ;;  %v976_v35 = vsel %vm968_vm2, 0.0, %v505_v30  ;;  %v711_v30 = vld [vmem:[%s2426_s3 + $0x98] sm:$0xff]  ;;  %vm1300_vm1 = vcmask 900096  }
  0xfc   : > { %vm1441_vm2 = vcmask 769024  }
  0xfd   : > { %510 = vadd.xlane.f32.xlu1 %v509_v31  ;;  %v700_v31 = vld [vmem:[%s2426_s3 + $0x40] sm:$0xff] }
  0xff   : > { %1042 = vrot.lane.b32.xlu0 %v984_v32, %s1910_s25  ;;  %v701_v32 = vld [vmem:[%s2426_s3 + $0x48] sm:$0xff] }
 0x103   : > { %1046 = vrot.lane.b32.xlu0 %v986_v33, %s1910_s25  ;;  %v702_v33 = vld [vmem:[%s2426_s3 + $0x50] sm:$0xff] }
 0x107   : > { %993 = vrot.lane.b32.xlu0 %v974_v34, %s1910_s25  ;;  %v703_v34 = vld [vmem:[%s2426_s3 + $0x58] sm:$0xff] }
 0x10b   : > { %997 = vrot.lane.b32.xlu0 %v976_v35, %s1910_s25 }
 0x10e   : > { %1016 = vrot.lane.b32.xlu1 %v502_v20, %s1910_s25  ;;  %v694_v20 = vld [vmem:[%s2426_s3 + $0x10] sm:$0xff] }
 0x112   : > { %1020 = vrot.lane.b32.xlu1 %v504_v29, %s1910_s25  ;;  %v699_v29 = vld [vmem:[%s2426_s3 + $0x38] sm:$0xff] }
 0x116   : > { %1040 = vrot.lane.b32.xlu1 %v983_v38, %s1910_s25 }
 0x11a   : > { %1044 = vrot.lane.b32.xlu1 %v985_v39, %s1910_s25 }
 0x11e   : > { %991 = vrot.lane.b32.xlu1 %v973_v40, %s1910_s25 }
 0x122   : > { %995 = vrot.lane.b32.xlu1 %v975_v41, %s1910_s25  ;;  %s1914_s25 = smov 127  }
 0x186   : > { %v508_v42 = vpop.xlane.xlu1 %507 }
 0x187   : > { %v513_v44 = vmul.f32 0.00390625, %v508_v42 }
 0x18a   : > { %v511_v43 = vpop.xlane.xlu1 %510 }
 0x18b   : > { %v514_v45 = vmul.f32 0.00390625, %v511_v43 }
 0x18d   : > { %v1777_v46 = vpack.c.bf16 %v514_v45, %v513_v44 }
 0x18e   : > { %v1017_v55 = vpop.permute.xlu1 %1016 }
 0x18f   : > { %1778 = vmatpush3.bf16.msra.mxu1 %v1777_v46 }
 0x190   : > { %1739 = vmatprep.subr.mxu1 %v1908_v0 }
 0x192   : > { %1737 = vmatmul.mubr.msk.f32.vlgmr.msra.gmra.mrb[0].mxu1 %vm517_vm6, %v515_v47 }
 0x193   : > { %1741 = vmatprep.mubr.msk.f32.mxu1 %vm1912_vm3, %v1908_v0 }
 0x265   : > { %v587_v49 = vpop.f32.mrb[0].mxu1 }
 0x266   : > { %v588_v50 = vadd.f32 %v587_v49, %v516_v48  ;;  %v1738_v51 = vpop.f32.mrb[1].mxu1 }
 0x268   : > { %v591_v52 = vmax.f32 %v588_v50, 0.0 }
 0x26a   : > { %1740 = vmatpush3.msk.msra.mxu1 %vm598_vm7, %v591_v52 }
 0x26b   : > { %1742 = vmatmul.mubr.msk.f32.vlgmr.msra.gmra.mrb[2].mxu1 %vm594_vm8, %v592_v53 }
 0x26c   : > { %1764 = vmatprep.mubr.msk.f32.mxu1 %vm594_vm8, %v704_v54  ;;  %v2162_v54 = vpop.permute.xlu0 %1018 }
 0x33e   : > { %v668_v57 = vpop.f32.mrb[2].mxu1 }
 0x33f   : > { %v669_v58 = vadd.f32 %v668_v57, %v593_v56  ;;  %v1743_v59 = vpop.f32.mrb[3].mxu1  ;;  %v1023_v56 = vpop.permute.xlu0 %1022 }
 0x340   : > { %v1021_v57 = vpop.permute.xlu1 %1020 }
 0x341   : > { %v673_v60 = vsel %vm672_vm9, %v669_v58, -inf }
 0x342   : > { %v674_v61 = vrot.slane %v673_v60, 4 }
 0x344   : > { %v675_v62 = vmax.f32 %v673_v60, %v674_v61  ;;  %v2166_v59 = vpop.permute.xlu1 %1040 }
 0x346   : > { %v676_v63 = vrot.slane %v675_v62, 2 }
 0x348   : > { %v677_v1 = vmax.f32 %v675_v62, %v676_v63  ;;  %v2170_v61 = vpop.permute.xlu1 %1044 }
 0x34a   : > { %v678_v2 = vrot.slane %v677_v1, 1 }
 0x34c   : > { %v679_v4 = vmax.f32 %v677_v1, %v678_v2  ;;  %v992_v63 = vpop.permute.xlu1 %991 }
 0x34e   : > { %v680_v5 = vsub.f32 %v669_v58, %v679_v4  ;;  %v2164_v58 = vpop.permute.xlu0 %1042 }
 0x350   : > { %v681_v6 = vmul.f32 1.442695, %v680_v5  ;;  %v996_v2 = vpop.permute.xlu1 %995 }
 0x352   : > { %1839 = vpow2.f32 %v681_v6  ;;  %v2168_v60 = vpop.permute.xlu0 %1046 }
 0x356   : > { %v994_v62 = vpop.permute.xlu0 %993 }
 0x35a   : > { %v998_v1 = vpop.permute.xlu0 %997 }
 0x35b   : > { %v2173_v4 = vsel %vm999_vm10, %v998_v1, 0.0  ;;  %v2176_v5 = vsel %vm999_vm10, %v996_v2, %v998_v1 }
 0x35c   : > { %v1840_v7 = vpop.eup %1839 }
 0x35d   : > { %v683_v8 = vsel %vm672_vm9, %v1840_v7, 0.0 }
 0x35e   : > { %v684_v9 = vrot.slane %v683_v8, 4 }
 0x360   : > { %v685_v10 = vadd.f32 %v684_v9, %v683_v8 }
 0x362   : > { %v686_v11 = vrot.slane %v685_v10, 2 }
 0x364   : > { %v687_v12 = vadd.f32 %v686_v11, %v685_v10  ;;  %v2181_v10 = vsel %vm999_vm10, %v992_v63, %v994_v62  ;;  %v2184_v11 = vsel %vm999_vm10, 0.0, %v992_v63 }
 0x366   : > { %v688_v13 = vrot.slane %v687_v12, 1 }
 0x368   : > { %v689_v14 = vadd.f32 %v688_v13, %v687_v12  ;;  %v2187_v12 = vsel %vm999_vm10, 0.0, %v996_v2 }
 0x36a   : > { %1841 = vrcp.f32 %v689_v14 }
 0x374   : > { %v1842_v15 = vpop.eup %1841 }
 0x375   : > { %v691_v16 = vmul.f32 %v1842_v15, %v1840_v7 }
 0x377   : > { %1744 = vmatprep.subr.msk.mxu0 %vm598_vm7, %v691_v16  ;;  %1783 = vmatprep.subr.msk.mxu1 %vm598_vm7, %v691_v16 }
 0x378   : > { %1745 = vmatpush3.msk.msra.mxu0 %vm598_vm7, %v691_v16  ;;  %1784 = vmatpush3.msk.msra.mxu1 %vm598_vm7, %v691_v16 }
 0x379   : > { %1765 = vmatmul.mubr.msk.f32.vlgmr.msra.gmra.mrb[4].mxu1 %vm594_vm8, %v705_v17  ;;  %1747 = vmatmul.mubr.msk.f32.vlgmr.msra.gmra.mrb[4].mxu0 %vm594_vm8, %v693_v18 }
 0x37a   : > { %1767 = vmatprep.mubr.msk.f32.mxu1 %vm594_vm8, %v706_v19  ;;  %1749 = vmatprep.mubr.msk.f32.mxu0 %vm594_vm8, %v694_v20 }
 0x37d   : > { %1768 = vmatmul.mubr.msk.f32.gmra.mrb[6].mxu1 %vm594_vm8, %v707_v21  ;;  %1750 = vmatmul.mubr.msk.f32.gmra.mrb[6].mxu0 %vm594_vm8, %v695_v22  ;;  %v2204_v21 = vsel %vm999_vm10, %v994_v62, 0.0 }
 0x37e   : > { %1752 = vmatprep.mubr.msk.f32.mxu0 %vm594_vm8, %v696_v23  ;;  %1770 = vmatprep.mubr.msk.f32.mxu1 %vm594_vm8, %v708_v24 }
 0x381   : > { %1753 = vmatmul.mubr.msk.f32.gmra.mrb[8].mxu0 %vm594_vm8, %v697_v25  ;;  %1771 = vmatmul.mubr.msk.f32.gmra.mrb[8].mxu1 %vm594_vm8, %v709_v26  ;;  %v2209_v25 = vsel %vm999_vm10, %v1023_v56, 0.0  ;;  %v2212_v26 = vsel %vm999_vm10, %v1021_v57, %v1023_v56 }
 0x382   : > { %1755 = vmatprep.mubr.msk.f32.mxu0 %vm594_vm8, %v698_v27  ;;  %1773 = vmatprep.mubr.msk.f32.mxu1 %vm594_vm8, %v710_v28 }
 0x385   : > { %1756 = vmatmul.mubr.msk.f32.gmra.mrb[10].mxu0 %vm594_vm8, %v699_v29  ;;  %1774 = vmatmul.mubr.msk.f32.gmra.mrb[10].mxu1 %vm594_vm8, %v711_v30  ;;  %v2217_v30 = vsel %vm999_vm10, 0.0, %v1021_v57  ;;  %v1058_v57 = vsel %vm999_vm10, %v2164_v58, 0.0 }
 0x386   : > { %1758 = vmatprep.mubr.msk.f32.mxu0 %vm594_vm8, %v700_v31  ;;  %1550 = vmatprep.mubr.f32.mxu1 %v1908_v0 }
 0x389   : > { %1759 = vmatmul.mubr.msk.f32.gmra.mrb[12].mxu0 %vm594_vm8, %v701_v32 }
 0x38a   : > { %1761 = vmatprep.mubr.msk.f32.mxu0 %vm594_vm8, %v702_v33 }
 0x38d   : > { %1762 = vmatmul.mubr.msk.f32.gmra.mrb[14].mxu0 %vm594_vm8, %v703_v34  ;;  %v2223_v34 = vsel %vm999_vm10, %v1017_v55, %v2162_v54 }
 0x44c   : > { %v1766_v35 = vpop.f32.mrb[4].mxu1  ;;  %v1748_v36 = vpop.f32.mrb[4].mxu0 }
 0x44d   : > { %1320 = vperm.xlu0 %1837, %v1766_v35   ;;  %v901_v37 = vpop.f32.mrb[5].mxu1  ;;  %v841_v38 = vpop.f32.mrb[5].mxu0 }
 0x44e   : > { %1315 = vperm.xlu1 %1838, %v901_v37   ;;  %v2228_v37 = vsel %vm999_vm10, 0.0, %v1017_v55 }
 0x450   : > { %v1769_v0 = vpop.f32.mrb[6].mxu1  ;;  %v1751_v39 = vpop.f32.mrb[6].mxu0 }
 0x451   : > { %1067 = vperm.xlu0 %1837, %v1748_v36   ;;  %v851_v40 = vpop.f32.mrb[7].mxu0  ;;  %v911_v41 = vpop.f32.mrb[7].mxu1 }
 0x452   : > { %1062 = vperm.xlu1 %1838, %v841_v38  }
 0x454   : > { %v1754_v42 = vpop.f32.mrb[8].mxu0  ;;  %v1772_v43 = vpop.f32.mrb[8].mxu1 }
 0x455   : > { %1367 = vperm.xlu0 %1837, %v1769_v0   ;;  %v921_v44 = vpop.f32.mrb[9].mxu1  ;;  %v861_v45 = vpop.f32.mrb[9].mxu0 }
 0x456   : > { %1085 = vperm.xlu1 %1838, %v1751_v39  }
 0x458   : > { %v1775_v46 = vpop.f32.mrb[10].mxu1  ;;  %v1757_v47 = vpop.f32.mrb[10].mxu0 }
 0x459   : > { %1080 = vperm.xlu0 %1837, %v851_v40   ;;  %v931_v48 = vpop.f32.mrb[11].mxu1  ;;  %v871_v49 = vpop.f32.mrb[11].mxu0 }
 0x45a   : > { %1362 = vperm.xlu1 %1838, %v911_v41   ;;  %v2234_v41 = vsel %vm999_vm10, %v2162_v54, 0.0 }
 0x45c   : > { %v1760_v50 = vpop.f32.mrb[12].mxu0 }
 0x45d   : > { %1132 = vperm.xlu0 %1837, %v1754_v42   ;;  %v881_v51 = vpop.f32.mrb[13].mxu0 }
 0x45e   : > { %1409 = vperm.xlu1 %1838, %v921_v44  }
 0x460   : > { %v1763_v52 = vpop.f32.mrb[14].mxu0 }
 0x461   : > { %1414 = vperm.xlu0 %1837, %v1772_v43   ;;  %v891_v53 = vpop.f32.mrb[15].mxu0 }
 0x462   : > { %1456 = vperm.xlu1 %1838, %v931_v48   ;;  %v2249_v48 = vsel %vm999_vm10, %v2170_v61, %v2168_v60 }
 0x465   : > { %1127 = vperm.xlu0 %1837, %v861_v45  }
 0x466   : > { %1221 = vperm.xlu1 %1838, %v881_v51  }
 0x469   : > { %1179 = vperm.xlu0 %1837, %v1757_v47   ;;  %v2244_v47 = vsel %vm999_vm10, %v2168_v60, 0.0  ;;  %v1056_v60 = vsel %vm999_vm10, 0.0, %v2166_v59 }
 0x46a   : > { %1268 = vperm.xlu1 %1838, %v891_v53   ;;  %v2258_v53 = vsel %vm999_vm10, 0.0, %v2170_v61 }
 0x46d   : > { %1461 = vperm.xlu0 %1837, %v1775_v46  }
 0x471   : > { %1174 = vperm.xlu0 %1837, %v871_v49  }
 0x475   : > { %1226 = vperm.xlu0 %1837, %v1760_v50  }
 0x479   : > { %1273 = vperm.xlu0 %1837, %v1763_v52   ;;  %v1048_v52 = vsel %vm999_vm10, %v2166_v59, %v2164_v58 }
 0x4cc   : > { %v1321_v6 = vpop.permute.xlu0 %1320 }
 0x4cd   : > { %v1327_v7 = vmul.f32 %v1321_v6, %v2176_v5  ;;  %v1328_v8 = vmul.f32 %v1321_v6, %v2173_v4  ;;  %v1316_v9 = vpop.permute.xlu1 %1315  ;;  %v1326_v14 = vmul.f32 %v1321_v6, %v2187_v12 }
 0x4ce   : > { %v1324_v15 = vmul.f32 %v1316_v9, %v2181_v10  ;;  %v1323_v22 = vmul.f32 %v1316_v9, %v2184_v11  ;;  %v1325_v23 = vmul.f32 %v1316_v9, %v2204_v21 }
 0x4cf   : > { %1345 = vrot.lane.b32.xlu0 %v1328_v8, %s1913_s21  ;;  %1343 = vrot.lane.b32.xlu1 %v1327_v7, %s1913_s21 }
 0x4d0   : > { %v1068_v13 = vpop.permute.xlu0 %1067 }
 0x4d1   : > { %v2192_v16 = vmul.f32 %v1068_v13, %v2187_v12  ;;  %v2195_v17 = vmul.f32 %v1068_v13, %v2176_v5  ;;  %v1063_v18 = vpop.permute.xlu1 %1062 }
 0x4d2   : > { %v2198_v19 = vmul.f32 %v1063_v18, %v2184_v11  ;;  %v2201_v20 = vmul.f32 %v1063_v18, %v2181_v10 }
 0x4d3   : > { %1341 = vrot.lane.b32.xlu0 %v1326_v14, %s1913_s21  ;;  %1337 = vrot.lane.b32.xlu1 %v1324_v15, %s1913_s21 }
 0x4d4   : > { %v1368_v27 = vpop.permute.xlu0 %1367 }
 0x4d5   : > { %v1086_v24 = vpop.permute.xlu1 %1085  ;;  %v1374_v31 = vmul.f32 %v1368_v27, %v2212_v26  ;;  %v1375_v35 = vmul.f32 %v1368_v27, %v2209_v25  ;;  %v1373_v0 = vmul.f32 %v1368_v27, %v2217_v30 }
 0x4d6   : > { %v1092_v28 = vmul.f32 %v1086_v24, %v2212_v26  ;;  %v1093_v29 = vmul.f32 %v1086_v24, %v2209_v25  ;;  %v1091_v32 = vmul.f32 %v1086_v24, %v2217_v30 }
 0x4d7   : > { %1339 = vrot.lane.b32.xlu0 %v1325_v23, %s1913_s21  ;;  %1335 = vrot.lane.b32.xlu1 %v1323_v22, %s1913_s21 }
 0x4d8   : > { %v1081_v33 = vpop.permute.xlu0 %1080 }
 0x4d9   : > { %v1089_v36 = vmul.f32 %v1081_v33, %v2223_v34  ;;  %v1088_v39 = vmul.f32 %v1081_v33, %v2228_v37  ;;  %v1363_v40 = vpop.permute.xlu1 %1362  ;;  %v1090_v42 = vmul.f32 %v1081_v33, %v2234_v41 }
 0x4da   : > { %v1371_v43 = vmul.f32 %v1363_v40, %v2223_v34  ;;  %v1370_v45 = vmul.f32 %v1363_v40, %v2228_v37  ;;  %v1372_v46 = vmul.f32 %v1363_v40, %v2234_v41 }
 0x4db   : > { %1110 = vrot.lane.b32.xlu0 %v1093_v29, %s1914_s25  ;;  %1108 = vrot.lane.b32.xlu1 %v1092_v28, %s1914_s25 }
 0x4dc   : > { %v1133_v38 = vpop.permute.xlu0 %1132 }
 0x4dd   : > { %v1139_v50 = vmul.f32 %v1133_v38, %v2249_v48  ;;  %v1140_v51 = vmul.f32 %v1133_v38, %v2244_v47  ;;  %v1138_v54 = vmul.f32 %v1133_v38, %v2258_v53  ;;  %v1410_v1 = vpop.permute.xlu1 %1409 }
 0x4de   : > { %v1418_v61 = vmul.f32 %v1410_v1, %v1048_v52  ;;  %v1419_v6 = vmul.f32 %v1410_v1, %v1058_v57  ;;  %v1417_v33 = vmul.f32 %v1410_v1, %v1056_v60 }
 0x4df   : > { %1390 = vrot.lane.b32.xlu1 %v1374_v31, %s1915_s26  ;;  %1106 = vrot.lane.b32.xlu0 %v1091_v32, %s1914_s25 }
 0x4e0   : > { %v2238_v44 = vpop.permute.xlu0 %1414 }
 0x4e1   : > { %v2273_v13 = vpop.permute.xlu1 %1456  ;;  %v1421_v31 = vmul.f32 %v2238_v44, %v2249_v48  ;;  %v1422_v32 = vmul.f32 %v2238_v44, %v2244_v47 }
 0x4e3   : > { %1102 = vrot.lane.b32.xlu1 %v1089_v36, %s1914_s25  ;;  %1392 = vrot.lane.b32.xlu0 %v1375_v35, %s1915_s26  ;;  %v1477_v35 = vld [vmem:[%s2432_s9] sm:$0xff] }
 0x4e4   : > { %v1128_v49 = vpop.permute.xlu0 %1127 }
 0x4e5   : > { %v1136_v55 = vmul.f32 %v1128_v49, %v1048_v52  ;;  %v1135_v62 = vmul.f32 %v1128_v49, %v1056_v60  ;;  %v1137_v63 = vmul.f32 %v1128_v49, %v1058_v57  ;;  %v1222_v22 = vpop.permute.xlu1 %1221 }
 0x4e7   : > { %1100 = vrot.lane.b32.xlu1 %v1088_v39, %s1914_s25  ;;  %1388 = vrot.lane.b32.xlu0 %v1373_v0, %s1915_s26 }
 0x4e8   : > { %v1180_v56 = vpop.permute.xlu0 %1179 }
 0x4e9   : > { %v1186_v7 = vmul.f32 %v1180_v56, %v2176_v5  ;;  %v1187_v58 = vmul.f32 %v1180_v56, %v2173_v4  ;;  %v1185_v59 = vmul.f32 %v1180_v56, %v2187_v12 }
 0x4eb   : > { %1104 = vrot.lane.b32.xlu0 %v1090_v42, %s1914_s25  ;;  %1384 = vrot.lane.b32.xlu1 %v1371_v43, %s1915_s26 }
 0x4ec   : > { %v2265_v2 = vpop.permute.xlu0 %1461 }
 0x4ef   : > { %1386 = vrot.lane.b32.xlu0 %v1372_v46, %s1915_s26  ;;  %1382 = vrot.lane.b32.xlu1 %v1370_v45, %s1915_s26  ;;  %s380_s26 = sand.u32 1, %s1898_s14  }
 0x4f0   : > { %v1175_v8 = vpop.permute.xlu0 %1174 }
 0x4f1   : > { %v1183_v9 = vmul.f32 %v1175_v8, %v2181_v10  ;;  %v1182_v14 = vmul.f32 %v1175_v8, %v2184_v11  ;;  %v1184_v15 = vmul.f32 %v1175_v8, %v2204_v21  ;;  %v1230_v10 = vmul.f32 %v1222_v22, %v2223_v34 }
 0x4f2   : > { %v1229_v11 = vmul.f32 %v1222_v22, %v2228_v37  ;;  %v1231_v21 = vmul.f32 %v1222_v22, %v2234_v41  ;;  %v1420_v34 = vmul.f32 %v2238_v44, %v2258_v53 }
 0x4f3   : > { %1157 = vrot.lane.b32.xlu0 %v1140_v51, %s1916_s27  ;;  %1155 = vrot.lane.b32.xlu1 %v1139_v50, %s1916_s27 }
 0x4f4   : > { %v1227_v18 = vpop.permute.xlu0 %1226 }
 0x4f5   : > { %v1233_v4 = vmul.f32 %v1227_v18, %v2212_v26  ;;  %v1234_v5 = vmul.f32 %v1227_v18, %v2209_v25  ;;  %v1232_v12 = vmul.f32 %v1227_v18, %v2217_v30  ;;  %v1269_v26 = vpop.permute.xlu1 %1268 }
 0x4f6   : > { %v1277_v27 = vmul.f32 %v1269_v26, %v1048_v52  ;;  %v1276_v29 = vmul.f32 %v1269_v26, %v1056_v60  ;;  %v1278_v30 = vmul.f32 %v1269_v26, %v1058_v57 }
 0x4f7   : > { %1153 = vrot.lane.b32.xlu0 %v1138_v54, %s1916_s27  ;;  %1149 = vrot.lane.b32.xlu1 %v1136_v55, %s1916_s27 }
 0x4f8   : > { %v1274_v23 = vpop.permute.xlu0 %1273 }
 0x4f9   : > { %v1280_v24 = vmul.f32 %v1274_v23, %v2249_v48  ;;  %v1281_v25 = vmul.f32 %v1274_v23, %v2244_v47  ;;  %v1279_v28 = vmul.f32 %v1274_v23, %v2258_v53 }
 0x4fb   : > { %1151 = vrot.lane.b32.xlu0 %v1137_v63, %s1916_s27  ;;  %1147 = vrot.lane.b32.xlu1 %v1135_v62, %s1916_s27  ;;  %s1663_s27 = sshll.u32 %s380_s26, 4 }
 0x4ff   : > { %1433 = vrot.lane.b32.xlu0 %v1419_v6, %s1917_s28  ;;  %1431 = vrot.lane.b32.xlu1 %v1418_v61, %s1917_s28 }
 0x503   : > { %1204 = vrot.lane.b32.xlu0 %v1187_v58, %s1918_s30  ;;  %1202 = vrot.lane.b32.xlu1 %v1186_v7, %s1918_s30 }
 0x507   : > { %1200 = vrot.lane.b32.xlu0 %v1185_v59, %s1918_s30  ;;  %1196 = vrot.lane.b32.xlu1 %v1183_v9, %s1918_s30 }
 0x50b   : > { %1198 = vrot.lane.b32.xlu0 %v1184_v15, %s1918_s30  ;;  %1194 = vrot.lane.b32.xlu1 %v1182_v14, %s1918_s30  ;;  %s382_s30 = scalar_lea.vmem [#allocation2], %s1663_s27 }
 0x50f   : > { %1251 = vrot.lane.b32.xlu0 %v1234_v5, %s1919_s11  ;;  %1249 = vrot.lane.b32.xlu1 %v1233_v4, %s1919_s11 }
 0x513   : > { %1247 = vrot.lane.b32.xlu0 %v1232_v12, %s1919_s11  ;;  %1243 = vrot.lane.b32.xlu1 %v1230_v10, %s1919_s11 }
 0x517   : > { %1245 = vrot.lane.b32.xlu0 %v1231_v21, %s1919_s11  ;;  %1241 = vrot.lane.b32.xlu1 %v1229_v11, %s1919_s11  ;;  %s1576_s11 = sshll.u32 %s382_s30, 4  ;;  %s2383_s11 = int_to_ptr.vmem [resolvable:$true] %s1576_s11 }
 0x518   : > { %s1844_s21 = scalar_lea.vmem %s2383_s11, 256 }
 0x519   : > { %p1845_p11 = scmp.ne.s32.totalorder %s2383_s11, %s1844_s21 }
 0x51b   : > { %1298 = vrot.lane.b32.xlu0 %v1281_v25, %s1920_s12  ;;  %1296 = vrot.lane.b32.xlu1 %v1280_v24, %s1920_s12  ;;  %p1846_p12 = pnand %p1845_p11, %p2015_p5 }
 0x51d   : > { %p1847_p13 = pneg %p1846_p12 }
 0x51f   : > { %1294 = vrot.lane.b32.xlu0 %v1279_v28, %s1920_s12  ;;  %1290 = vrot.lane.b32.xlu1 %v1277_v27, %s1920_s12 }
 0x523   : > { %1292 = vrot.lane.b32.xlu0 %v1278_v30, %s1920_s12  ;;  %1288 = vrot.lane.b32.xlu1 %v1276_v29, %s1920_s12 }
 0x527   : > { %1439 = vrot.lane.b32.xlu0 %v1422_v32, %s1917_s28  ;;  %1437 = vrot.lane.b32.xlu1 %v1421_v31, %s1917_s28 }
 0x52b   : > { %1435 = vrot.lane.b32.xlu0 %v1420_v34, %s1917_s28  ;;  %1429 = vrot.lane.b32.xlu1 %v1417_v33, %s1917_s28  ;;  %s1705_s28 = sshll.u32 %s1998_s17, 8  ;;  %s1562_s17 = scalar_lea.sflag [#allocation3], %s380_s26 }
 0x52c   : > { %s2381_s20 = scalar_lea.hbm %s2433_s10, %s1705_s28 }
 0x52f   : > { %1480 = vperm.xlu1 %1838, %v1477_v35  }
 0x541   : > { %v1346_v36 = vpop.permute.xlu0 %1345  ;;  %v1344_v37 = vpop.permute.xlu1 %1343 }
 0x542   : > { %v2299_v38 = vsel %vm1347_vm11, %v1344_v37, %v1346_v36 }
 0x545   : > { %v1342_v0 = vpop.permute.xlu0 %1341  ;;  %v1338_v39 = vpop.permute.xlu1 %1337 }
 0x546   : > { %v2301_v40 = vsel %vm1347_vm11, %v1342_v0, %v1344_v37 }
 0x549   : > { %v1340_v41 = vpop.permute.xlu0 %1339  ;;  %v1336_v42 = vpop.permute.xlu1 %1335 }
 0x54a   : > { %v2303_v43 = vsel %vm1347_vm11, %v1338_v39, %v1340_v41  ;;  %v2305_v44 = vsel %vm1347_vm11, %v1336_v42, %v1338_v39 }
 0x54d   : > { %v1111_v45 = vpop.permute.xlu0 %1110  ;;  %v1109_v46 = vpop.permute.xlu1 %1108 }
 0x54e   : > { %v1116_v47 = vsel %vm1112_vm12, %v1109_v46, %v1111_v45 }
 0x54f   : > { %v1124_v48 = vadd.f32 %v1116_v47, %v2195_v17 }
 0x551   : > { %v1107_v49 = vpop.permute.xlu0 %1106  ;;  %v1391_v50 = vpop.permute.xlu1 %1390 }
 0x552   : > { %v1115_v51 = vsel %vm1112_vm12, %v1107_v49, %v1109_v46 }
 0x553   : > { %v1123_v52 = vadd.f32 %v1115_v51, %v2192_v16 }
 0x555   : > { %v1393_v53 = vpop.permute.xlu0 %1392  ;;  %v1103_v54 = vpop.permute.xlu1 %1102 }
 0x556   : > { %v2312_v55 = vsel %vm1394_vm13, %v1391_v50, %v1393_v53 }
 0x559   : > { %v1389_v56 = vpop.permute.xlu0 %1388  ;;  %v1101_v57 = vpop.permute.xlu1 %1100 }
 0x55a   : > { %v2315_v60 = vsel %vm1394_vm13, %v1389_v56, %v1391_v50  ;;  %v1113_v31 = vsel %vm1112_vm12, %v1101_v57, %v1103_v54 }
 0x55b   : > { %v1121_v45 = vadd.f32 %v1113_v31, %v2198_v19 }
 0x55d   : > { %v1105_v62 = vpop.permute.xlu0 %1104  ;;  %v2317_v63 = vpop.permute.xlu1 %1384 }
 0x55e   : > { %v1114_v32 = vsel %vm1112_vm12, %v1103_v54, %v1105_v62 }
 0x55f   : > { %v1122_v46 = vadd.f32 %v1114_v32, %v2201_v20 }
 0x561   : > { %v2319_v17 = vpop.permute.xlu0 %1386  ;;  %v2321_v1 = vpop.permute.xlu1 %1382 }
 0x565   : > { %v1158_v61 = vpop.permute.xlu0 %1157  ;;  %v1156_v16 = vpop.permute.xlu1 %1155 }
 0x566   : > { %v1163_v23 = vsel %vm1159_vm14, %v1156_v16, %v1158_v61 }
 0x567   : > { %v1171_v25 = vadd.f32 %v1163_v23, %v1124_v48 }
 0x569   : > { %v1154_v6 = vpop.permute.xlu0 %1153  ;;  %v1150_v7 = vpop.permute.xlu1 %1149 }
 0x56a   : > { %v1162_v28 = vsel %vm1159_vm14, %v1154_v6, %v1156_v16 }
 0x56b   : > { %v1170_v34 = vadd.f32 %v1162_v28, %v1123_v52 }
 0x56d   : > { %v1152_v58 = vpop.permute.xlu0 %1151  ;;  %v1148_v8 = vpop.permute.xlu1 %1147 }
 0x56e   : > { %v1161_v0 = vsel %vm1159_vm14, %v1150_v7, %v1152_v58  ;;  %v1160_v39 = vsel %vm1159_vm14, %v1148_v8, %v1150_v7 }
 0x56f   : > { %v1169_v51 = vadd.f32 %v1161_v0, %v1122_v46  ;;  %v1168_v52 = vadd.f32 %v1160_v39, %v1121_v45  ;;  %v1476_v45 = vld [vmem:[%s2431_s8] sm:$0xff] }
 0x571   : > { %v2323_v59 = vpop.permute.xlu0 %1433  ;;  %v2325_v9 = vpop.permute.xlu1 %1431 }
 0x575   : > { %v1205_v14 = vpop.permute.xlu0 %1204  ;;  %v1203_v15 = vpop.permute.xlu1 %1202 }
 0x576   : > { %v1210_v24 = vsel %vm1206_vm15, %v1203_v15, %v1205_v14 }
 0x577   : > { %v1218_v30 = vadd.f32 %v1210_v24, %v1171_v25 }
 0x579   : > { %v1201_v18 = vpop.permute.xlu0 %1200  ;;  %v1197_v4 = vpop.permute.xlu1 %1196 }
 0x57a   : > { %v1209_v33 = vsel %vm1206_vm15, %v1201_v18, %v1203_v15 }
 0x57b   : > { %v1217_v47 = vadd.f32 %v1209_v33, %v1170_v34 }
 0x57d   : > { %v1199_v5 = vpop.permute.xlu0 %1198  ;;  %v1195_v22 = vpop.permute.xlu1 %1194 }
 0x57e   : > { %v1208_v49 = vsel %vm1206_vm15, %v1197_v4, %v1199_v5  ;;  %v1207_v50 = vsel %vm1206_vm15, %v1195_v22, %v1197_v4 }
 0x57f   : > { %v1216_v20 = vadd.f32 %v1208_v49, %v1169_v51  ;;  %v1215_v16 = vadd.f32 %v1207_v50, %v1168_v52  ;;  %v1843_v50 = vld [vmem:[%s2031_s29 + $0x8] sm:$0xff]  ;;  %s1921_s29 = smov [#allocation2]  }
 0x580   : > { %s1848_s25 = sshll.u32 %s1921_s29, 4  ;;  %s1849_s25 = int_to_ptr.vmem [resolvable:$false] %s1848_s25 }
 0x581   : > { %v1252_v10 = vpop.permute.xlu0 %1251  ;;  %v1250_v12 = vpop.permute.xlu1 %1249  ;;  %s1850_s27 = scalar_lea.vmem %s1849_s25, 512  ;;  %p1851_p0 = scmp.lt.s32.totalorder %s2383_s11, %s1849_s25 }
 0x582   : > { %v1257_v29 = vsel %vm1253_vm0, %v1250_v12, %v1252_v10  ;;  %p1852_p1 = scmp.lt.s32.totalorder %s1850_s27, %s1844_s21 }
 0x583   : > { %v1265_v35 = vadd.f32 %v1257_v29, %v1218_v30 }
 0x584   : > { %p1853_p2 = por %p1852_p1, %p1851_p0 }
 0x585   : > { %v1248_v11 = vpop.permute.xlu0 %1247  ;;  %v1244_v21 = vpop.permute.xlu1 %1243 }
 0x586   : > { %v1256_v41 = vsel %vm1253_vm0, %v1248_v11, %v1250_v12  ;;  %p1854_p3 = pnand %p1853_p2, %p1847_p13 }
 0x587   : > { %v1264_v53 = vadd.f32 %v1256_v41, %v1217_v47 }
 0x589   : > { %v1246_v26 = vpop.permute.xlu0 %1245  ;;  %v1242_v27 = vpop.permute.xlu1 %1241 }
 0x58a   : > { %v1255_v62 = vsel %vm1253_vm0, %v1244_v21, %v1246_v26  ;;  %v1254_v61 = vsel %vm1253_vm0, %v1242_v27, %v1244_v21  ;;  %v1395_v26 = vsel %vm1394_vm13, %v2321_v1, %v2317_v63 }
 0x58b   : > { %v1263_v58 = vadd.f32 %v1255_v62, %v1216_v20  ;;  %v1262_v8 = vadd.f32 %v1254_v61, %v1215_v16 }
 0x58d   : > { %v1299_v36 = vpop.permute.xlu0 %1298  ;;  %v1297_v37 = vpop.permute.xlu1 %1296 }
 0x58e   : > { %v1304_v42 = vsel %vm1300_vm1, %v1297_v37, %v1299_v36 }
 0x58f   : > { %v1312_v48 = vadd.f32 %v1304_v42, %v1265_v35 }
 0x591   : > { %v1359_v54 = vadd.f32 %v2299_v38, %v1312_v48  ;;  %v1295_v56 = vpop.permute.xlu0 %1294  ;;  %v1291_v57 = vpop.permute.xlu1 %1290 }
 0x592   : > { %v1303_v19 = vsel %vm1300_vm1, %v1295_v56, %v1297_v37 }
 0x593   : > { %v1311_v6 = vadd.f32 %v1303_v19, %v1264_v53  ;;  %v1406_v7 = vadd.f32 %v2312_v55, %v1359_v54 }
 0x595   : > { %v1358_v14 = vadd.f32 %v2301_v40, %v1311_v6  ;;  %v1293_v15 = vpop.permute.xlu0 %1292  ;;  %v1289_v18 = vpop.permute.xlu1 %1288  ;;  %v1396_v40 = vsel %vm1394_vm13, %v2317_v63, %v2319_v17 }
 0x596   : > { %v1302_v38 = vsel %vm1300_vm1, %v1291_v57, %v1293_v15  ;;  %v1301_v4 = vsel %vm1300_vm1, %v1289_v18, %v1291_v57 }
 0x597   : > { %v1310_v5 = vadd.f32 %v1302_v38, %v1263_v58  ;;  %v1309_v22 = vadd.f32 %v1301_v4, %v1262_v8  ;;  %v1405_v10 = vadd.f32 %v2315_v60, %v1358_v14 }
 0x599   : > { %v1357_v12 = vadd.f32 %v2303_v43, %v1310_v5  ;;  %v1356_v11 = vadd.f32 %v2305_v44, %v1309_v22  ;;  %v1440_v55 = vpop.permute.xlu0 %1439  ;;  %v1438_v21 = vpop.permute.xlu1 %1437  ;;  %v1443_v43 = vsel %vm1441_vm2, %v2325_v9, %v2323_v59 }
 0x59a   : > { %v1445_v23 = vsel %vm1441_vm2, %v1438_v21, %v1440_v55 }
 0x59b   : > { %v1404_v24 = vadd.f32 %v1396_v40, %v1357_v12  ;;  %v1453_v25 = vadd.f32 %v1445_v23, %v1406_v7  ;;  %v1403_v28 = vadd.f32 %v1395_v26, %v1356_v11 }
 0x59d   : > { %v1451_v60 = vadd.f32 %v1443_v43, %v1404_v24  ;;  %v1467_v44 = vadd.f32 %v2265_v2, %v1453_v25  ;;  %v1436_v27 = vpop.permute.xlu0 %1435  ;;  %v1430_v29 = vpop.permute.xlu1 %1429 }
 0x59e   : > { %v1444_v17 = vsel %vm1441_vm2, %v1436_v27, %v1438_v21  ;;  %v1442_v30 = vsel %vm1441_vm2, %v1430_v29, %v2325_v9 }
 0x59f   : > { %v1471_v31 = vmax.f32 %v1467_v44, 0.0  ;;  %v1452_v32 = vadd.f32 %v1444_v17, %v1405_v10  ;;  %v1450_v33 = vadd.f32 %v1442_v30, %v1403_v28  ;;  %v1465_v63 = vadd.f32 %v2273_v13, %v1451_v60 }
 0x5a1   : > { %v1466_v1 = vadd.f32 %v2265_v2, %v1452_v32  ;;  %v1464_v59 = vadd.f32 %v2273_v13, %v1450_v33  ;;  %v1469_v34 = vmax.f32 %v1465_v63, 0.0  ;;  %v1475_v35 = vmin.f32 %v1471_v31, 6.0 }
 0x5a3   : > { %v1470_v36 = vmax.f32 %v1466_v1, 0.0  ;;  %v1468_v37 = vmax.f32 %v1464_v59, 0.0  ;;  %v1473_v0 = vmin.f32 %v1469_v34, 6.0 }
 0x5a5   : > { %v1474_v39 = vmin.f32 %v1470_v36, 6.0  ;;  %v1472_v41 = vmin.f32 %v1468_v37, 6.0  ;;  %v1779_v42 = vpack.c.bf16 %v1475_v35, %v1473_v0 }
 0x5a7   : > { %1780 = vmatprep.subr.bf16.mxu1 %v1779_v42  ;;  %v1781_v9 = vpack.c.bf16 %v1474_v39, %v1472_v41 }
 0x5a9   : > { %1782 = vmatpush1.bf16.msra.mxu1 %v1781_v9 }
 0x5ac   : > { %1696 = vmatmul.mubr.msk.f32.vlgmr.msra.gmra.mrb[12].mxu1 %vm517_vm6, %v1476_v45 }
 0x5ae   : > { %v1481_v2 = vpop.permute.xlu1 %1480 }
 0x67f   : > { %v1552_v13 = vpop.f32.mrb[12].mxu1 }
 0x680   : > { %v1553_v46 = vadd.f32 %v1552_v13, %v1481_v2  ;;  %v1554_v47 = vpop.f32.mrb[13].mxu1 }
 0x681   : > { %v1555_v48 = vadd.f32 %v1554_v47, %v1481_v2 }
 0x682   : > { %v1557_v49 = vadd.f32 %v1553_v46, %v2038_v3 }
 0x683   : > { %v1558_v51 = vadd.f32 %v1843_v50, %v1555_v48 }
 0x684   : > { %1559 = vst [vmem:[%s382_s30] sm:$0xff] %v1557_v49 }
 0x685   : > { %1560 = vst [vmem:[%s382_s30 + $0x8] sm:$0xff] %v1558_v51 }
 0x686   : > { %1857 = shalt.err (!%p1854_p3)
}
 0x687   : > { %s1858_s26 = scalar_lea.hbm %s2381_s20, 256  ;;  %s1862_s12 = scalar_lea.hbm %s2433_s10, 512 }
 0x688   : > { %p1859_p4 = scmp.ne.s32.totalorder %s2381_s20, %s1858_s26  ;;  %p1863_p9 = scmp.lt.u32.totalorder %s2381_s20, %s2433_s10 }
 0x689   : > { %p1864_p10 = scmp.lt.u32.totalorder %s1862_s12, %s1858_s26  ;;  %p1866_p12 = scmp.lt.u32.totalorder %s1858_s26, %s2381_s20 }
 0x68a   : > { %p1860_p7 = pnand %p1859_p4, %p2015_p5 }
 0x68b   : > { %p1865_p11 = por %p1864_p10, %p1863_p9 }
 0x68c   : > { %p1861_p8 = pneg %p1860_p7 }
 0x68d   : > { %p1867_p13 = por %p1866_p12, %p1865_p11 }
 0x68f   : > { %p1868_p0 = pnand %p1867_p13, %p1861_p8 }
 0x691   : > { %1871 = shalt.err (!%p1868_p0)
}
 0x692   : > { %1785 = dma.vmem_to_hbm [thread:$0]  (%p2015_p5), %s2383_s11, 256, %s2381_s20, %s1562_s17  }
 0x693 PF: > { %p1791_p1 = scmp.ge.s32.totalorder %s1906_s16, 2  ;;  %s1588_s21 = sand.u32 1, %s1894_s13  }
 0x694   : > { %s1589_s25 = scalar_lea.sflag [#allocation3], %s1588_s21 }
 0x695   : > { %p1788_p2 = pnand %p1791_p1, %p2019_p6 }
 0x697   : > { %1889 = dma.done.wait (!%p1788_p2), %s1589_s25, 256  }
 0x698   : > { %1891 = vsyncadd (!%p1788_p2), %s1589_s25, 4294967040  ;;  %p20_p3 = scmp.ge.s32.totalorder %s2002_s19, 4   ;;  %s2436_s13 = smov %s1898_s14 }
 0x699   : > { %s2437_s14 = smov %s1902_s15  ;;  %s2438_s15 = smov %s2013_s22 }
 0x69a   : > { %s2439_s16 = smov %s2002_s19  ;;  %22 = sbr.rel (!%p20_p3) target bundleno = 3 (0x3), region = 101 }
 0x6a1   :  { %1594 = vsyncpa [#allocation3], 1 }
 0x6a2   :  { %1596 = vsyncpa [#allocation3 + $0x1], 1 }

</bundles_post_ra>
